<compile_context>
chip_gen: v7x
topology: tpu7x:2x2x1
jax: 0.10.0
libtpu: 0.0.40
codegen_flags: <defaults>
</compile_context>

<pallas_src>
import math

import numpy as np
import jax
import jax.numpy as jnp
from jax.experimental import pallas as pl
from jax.experimental.pallas import tpu as pltpu


def _round_up(x, m):
    return ((x + m - 1) // m) * m


# ----------------------------- Pallas kernel ------------------------------ #
def _melspec_kernel(f_ref, w_ref, m_ref, o_ref):
    # f_ref : (TR, n_fft)   pre-emphasized frames (zero-padded rows are fine)
    # w_ref : (n_fft, 2*F)  fused windowed DFT matrix [cos | -sin]
    # m_ref : (F, M_pad)    mel filterbank (freq x mel), zero-padded
    # o_ref : (TR, M_pad)   mel spectrogram rows
    n_bins = m_ref.shape[0]
    rr = jnp.dot(f_ref[...], w_ref[...], preferred_element_type=jnp.float32)
    re = rr[:, :n_bins]
    im = rr[:, n_bins:]
    power = re * re + im * im                       # |X(f)|^2
    o_ref[...] = jnp.dot(power, m_ref[...], preferred_element_type=jnp.float32)


def _pallas_melspec(frames, fused_dft, mel_m, tile_rows):
    R, n_fft = frames.shape
    _, f2 = fused_dft.shape
    n_bins, m_pad = mel_m.shape
    assert R % tile_rows == 0
    return pl.pallas_call(
        _melspec_kernel,
        out_shape=jax.ShapeDtypeStruct((R, m_pad), jnp.float32),
        grid_spec=pltpu.PrefetchScalarGridSpec(
            num_scalar_prefetch=0,
            grid=(R // tile_rows,),
            in_specs=[
                # per-tile frames: pipelined / double-buffered automatically
                pl.BlockSpec((tile_rows, n_fft), lambda i: (i, 0)),
                # weights: constant block index -> DMA'd once, VMEM resident
                pl.BlockSpec((n_fft, f2), lambda i: (0, 0)),
                pl.BlockSpec((n_bins, m_pad), lambda i: (0, 0)),
            ],
            out_specs=pl.BlockSpec((tile_rows, m_pad), lambda i: (i, 0)),
        ),
        compiler_params=pltpu.CompilerParams(
            # independent row tiles -> megacore sharding on v7x, neutral elsewhere
            dimension_semantics=("parallel",)),
    )(frames, fused_dft, mel_m)


# ------------------------- parameter construction ------------------------- #
def _hz_to_mel(f):
    return 2595.0 * math.log10(1.0 + f / 700.0)


def _mel_to_hz(m):
    return 700.0 * (10.0 ** (m / 2595.0) - 1.0)


def _mel_filterbank(n_mels, n_freq, sample_rate, n_fft):
    # Deterministic triangular (HTK-style) mel filterbank, shape (n_mels, n_freq).
    f_min, f_max = 0.0, sample_rate / 2.0
    m_pts = np.linspace(_hz_to_mel(f_min), _hz_to_mel(f_max), n_mels + 2)
    f_pts = np.array([_mel_to_hz(float(m)) for m in m_pts], dtype=np.float64)
    # snap the outer edges exactly (kills mel<->hz round-trip epsilon) so the
    # DC and Nyquist bins get an exact zero weight -> they can be trimmed.
    f_pts[0], f_pts[-1] = f_min, f_max
    bins_hz = np.arange(n_freq, dtype=np.float64) * (sample_rate / n_fft)
    lower = f_pts[:-2][:, None]
    center = f_pts[1:-1][:, None]
    upper = f_pts[2:][:, None]
    up = (bins_hz[None, :] - lower) / np.maximum(center - lower, 1e-6)
    down = (upper - bins_hz[None, :]) / np.maximum(upper - center, 1e-6)
    fb = np.maximum(0.0, np.minimum(up, down))
    return fb.astype(np.float32)


def _dft_matrices(n_fft, n_bins, window):
    # Hann-windowed real-DFT matrices for bins k = 0 .. n_bins-1.
    n = np.arange(n_fft, dtype=np.float64)[:, None]
    k = np.arange(n_bins, dtype=np.float64)[None, :]
    ang = 2.0 * math.pi * n * k / n_fft
    cos_m = (np.cos(ang) * window[:, None]).astype(np.float32)
    sin_m = (-np.sin(ang) * window[:, None]).astype(np.float32)
    return cos_m, sin_m


# ------------------------------ module wrapper ----------------------------- #
class MelSpectrogramPallas:
    """Pallas equivalent of MelSpectrogram(sample_rate, coef, n_fft, win_length,
    hop) with the given defaults with_delta=False, with_emphasis=True,
    in_db=False, frq_mask=False."""

    def __init__(self, sample_rate, coef, n_fft, win_length, hop,
                 n_mels=40, with_emphasis=True, tile_rows=256):
        self.sample_rate = sample_rate
        self.coef = coef                    # pre-emphasis coefficient
        self.n_fft = n_fft
        self.win_length = win_length
        self.hop = hop
        self.n_mels = n_mels
        self.with_emphasis = with_emphasis
        assert tile_rows % 8 == 0
        self.tile_rows = int(tile_rows)     # MXU-width-aligned row tile

        n_freq = n_fft // 2 + 1
        self.n_freq = n_freq
        self.M_pad = _round_up(n_mels, 128)

        # TODO(synk): symmetric Hann window / center=False framing; swap for a
        # periodic window + reflect-centered frames if the reference frontend
        # uses torchaudio defaults.
        window = np.hanning(win_length).astype(np.float32)
        if win_length < n_fft:
            window = np.pad(window, (0, n_fft - win_length))

        fb = _mel_filterbank(n_mels, n_freq, sample_rate, n_fft)  # (n_mels, n_freq)

        # Keep only the frequency bins that carry nonzero mel weight, rounded
        # up to a lane multiple of 128 (DC/Nyquist are exactly zero, so
        # n_freq=129 -> 128).  Any extra rounded-up bins have zero mel weight,
        # so the trimmed contraction is mathematically identical.
        nz_cols = np.nonzero(np.any(fb != 0.0, axis=0))[0]
        last_nz = int(nz_cols[-1]) + 1 if nz_cols.size else 1
        self.F_used = max(128, _round_up(last_nz, 128))

        cos_m, sin_m = _dft_matrices(n_fft, self.F_used, window)
        self.fused_dft = jnp.asarray(
            np.concatenate([cos_m, sin_m], axis=1))               # (n_fft, 2F)

        mel_t = fb.T                                              # (n_freq, n_mels)
        if self.F_used <= n_freq:
            mel_t = mel_t[:self.F_used]
        else:
            mel_t = np.pad(mel_t, ((0, self.F_used - n_freq), (0, 0)))
        self.mel_m = jnp.asarray(
            np.pad(mel_t, ((0, 0), (0, self.M_pad - n_mels))).astype(np.float32))

        # full-size copies for the pure-JAX reference path
        self._fb_full = jnp.asarray(fb)
        self._window_full = window

    # -------- shared wrapper-side preprocessing (pre-emphasis + framing) ----
    def _preemphasis_and_frames(self, x):
        x = x.astype(jnp.float32)
        B, N = x.shape
        # pre-emphasis: y[t] = x[t] - coef * x[t-1], first sample kept
        if self.with_emphasis:
            x = jnp.concatenate([x[:, :1], x[:, 1:] - self.coef * x[:, :-1]], axis=1)
        # framing (no centering): T frames of win_length, stride hop
        T = 1 + (N - self.win_length) // self.hop
        idx = (jnp.arange(T)[:, None] * self.hop
               + jnp.arange(self.win_length)[None, :])
        frames = x[:, idx]                                        # (B, T, win_length)
        if self.win_length < self.n_fft:
            frames = jnp.pad(frames, ((0, 0), (0, 0),
                                      (0, self.n_fft - self.win_length)))
        return frames, B, T
        # TODO(synk): on v5e, fold pre-emphasis into the DFT matrix / frame
        # inside the kernel via pl.ANY + make_async_copy to cut HBM traffic.

    def __call__(self, x):
        assert x.ndim == 2, f"Input size error in Spectrogram. Need 2, but get {x.ndim}"
        frames, B, T = self._preemphasis_and_frames(x)
        R = B * T
        frames = frames.reshape(R, self.n_fft)

        # pad rows to a full MXU-width tile multiple (padded rows give zeros
        # and are sliced away below)
        R_pad = _round_up(R, self.tile_rows)
        if R_pad != R:
            frames = jnp.pad(frames, ((0, R_pad - R), (0, 0)))

        out = _pallas_melspec(frames, self.fused_dft, self.mel_m, self.tile_rows)

        out = out[:R, :self.n_mels].reshape(B, T, self.n_mels)
        # torchaudio convention: (B, n_mels, T)
        return jnp.transpose(out, (0, 2, 1))

        # TODO(synk): in_db / delta features / FrequencyMasking branches are
        # disabled by the given defaults and not implemented here.

    # ------------- pure-JAX reference (full n_freq, no trimming) -----------
    def reference(self, x):
        frames, B, T = self._preemphasis_and_frames(x)            # (B, T, n_fft)
        n = np.arange(self.n_fft, dtype=np.float64)[:, None]
        k = np.arange(self.n_freq, dtype=np.float64)[None, :]
        ang = 2.0 * math.pi * n * k / self.n_fft
        w = self._window_full.astype(np.float64)[:, None]
        cos_m = jnp.asarray((np.cos(ang) * w).astype(np.float32))
        sin_m = jnp.asarray((-np.sin(ang) * w).astype(np.float32))
        hp = jax.lax.Precision.HIGHEST
        re = jnp.einsum('btn,nf->btf', frames, cos_m, precision=hp)
        im = jnp.einsum('btn,nf->btf', frames, sin_m, precision=hp)
        power = re * re + im * im                                 # (B, T, n_freq)
        mel = jnp.einsum('btf,mf->btm', power, self._fb_full, precision=hp)
        return jnp.transpose(mel, (0, 2, 1))                      # (B, n_mels, T)


# ----------------------------------- main ---------------------------------- #
if __name__ == "__main__":
    sample_rate = 16000
    coef = 0.97
    n_fft = 256
    win_length = 256
    hop = 128
    n_mels = 40

    mel = MelSpectrogramPallas(sample_rate, coef, n_fft, win_length, hop,
                               n_mels=n_mels)

    key = jax.random.PRNGKey(0)
    # ~1 second of 16 kHz audio per batch element -> 129 frames, 2 row tiles
    x = jax.random.normal(key, (2, 16640), dtype=jnp.float32)

    y = mel(x)
    jax.block_until_ready(y)

    T = 1 + (x.shape[1] - win_length) // hop
    assert y.shape == (2, n_mels, T), y.shape

    # correctness vs. full-size (untrimmed, unpadded) pure-JAX reference
    y_ref = mel.reference(x)
    jax.block_until_ready(y_ref)
    err = float(jnp.max(jnp.abs(y - y_ref)))
    scale = 1.0 + float(jnp.max(jnp.abs(y_ref)))
    assert err <= 2e-3 * scale, (err, scale)

    print("KERNEL_OK")
</pallas_src>

<mosaic_0001>
module attributes {stable_mosaic.version = 11 : i64} {
  func.func @_melspec_kernel(%arg0: i32, %arg1: memref<256x256xf32, #tpu.memory_space<vmem>>, %arg2: memref<256x256xf32, #tpu.memory_space<vmem>>, %arg3: memref<128x128xf32, #tpu.memory_space<vmem>>, %arg4: memref<256x128xf32, #tpu.memory_space<vmem>>) attributes {dimension_semantics = [#tpu.dimension_semantics<parallel>], iteration_bounds = array<i64: 2>, scalar_prefetch = 0 : i64, scratch_operands = 0 : i64, tpu.core_type = #tpu.core_type<tc>, window_params = [{transform_indices = @transform_0, window_bounds = array<i64: 256, 256>}, {pipeline_mode = #tpu.pipeline_mode<synchronous>, transform_indices = @transform_1, window_bounds = array<i64: 256, 256>}, {pipeline_mode = #tpu.pipeline_mode<synchronous>, transform_indices = @transform_2, window_bounds = array<i64: 128, 128>}, {transform_indices = @transform_3, window_bounds = array<i64: 256, 128>}]} {
    %c0 = arith.constant 0 : index
    %c0_0 = arith.constant 0 : index
    %0 = vector.load %arg1[%c0, %c0_0] : memref<256x256xf32, #tpu.memory_space<vmem>>, vector<256x256xf32>
    %c0_1 = arith.constant 0 : index
    %c0_2 = arith.constant 0 : index
    %1 = vector.load %arg2[%c0_1, %c0_2] : memref<256x256xf32, #tpu.memory_space<vmem>>, vector<256x256xf32>
    %cst = arith.constant dense<0.000000e+00> : vector<256x256xf32>
    %2 = tpu.matmul %0, %1, %cst {dimension_numbers = #tpu.dot_dimension_numbers<[1], [0], [0], [1], [0, 0, 1, 1], [], []>} : vector<256x256xf32>, vector<256x256xf32>, vector<256x256xf32> -> vector<256x256xf32>
    %3 = vector.extract_strided_slice %2 {offsets = [0, 0], sizes = [256, 128], strides = [1, 1]} : vector<256x256xf32> to vector<256x128xf32>
    %4 = vector.extract_strided_slice %2 {offsets = [0, 128], sizes = [256, 128], strides = [1, 1]} : vector<256x256xf32> to vector<256x128xf32>
    %5 = arith.mulf %3, %3 : vector<256x128xf32>
    %6 = arith.mulf %4, %4 : vector<256x128xf32>
    %7 = arith.addf %5, %6 : vector<256x128xf32>
    %c0_3 = arith.constant 0 : index
    %c0_4 = arith.constant 0 : index
    %8 = vector.load %arg3[%c0_3, %c0_4] : memref<128x128xf32, #tpu.memory_space<vmem>>, vector<128x128xf32>
    %cst_5 = arith.constant dense<0.000000e+00> : vector<256x128xf32>
    %9 = tpu.matmul %7, %8, %cst_5 {dimension_numbers = #tpu.dot_dimension_numbers<[1], [0], [0], [1], [0, 0, 1, 1], [], []>} : vector<256x128xf32>, vector<128x128xf32>, vector<256x128xf32> -> vector<256x128xf32>
    %c0_6 = arith.constant 0 : index
    %c0_7 = arith.constant 0 : index
    %10 = vector.load %arg4[%c0_6, %c0_7] : memref<256x128xf32, #tpu.memory_space<vmem>>, vector<256x128xf32>
    tpu.vector_store %arg4[%c0_6, %c0_7], %9 {strides = array<i32>} : memref<256x128xf32, #tpu.memory_space<vmem>>, vector<256x128xf32>,
    return
  }
  func.func @transform_0(%arg0: i32) -> (i32, i32) {
    %c0_i32 = arith.constant 0 : i32
    %c0_i32_0 = arith.constant 0 : i32
    return %arg0, %c0_i32 : i32, i32
  }
  func.func @transform_1(%arg0: i32) -> (i32, i32) {
    %c0_i32 = arith.constant 0 : i32
    %c0_i32_0 = arith.constant 0 : i32
    %c0_i32_1 = arith.constant 0 : i32
    return %c0_i32, %c0_i32_0 : i32, i32
  }
  func.func @transform_2(%arg0: i32) -> (i32, i32) {
    %c0_i32 = arith.constant 0 : i32
    %c0_i32_0 = arith.constant 0 : i32
    %c0_i32_1 = arith.constant 0 : i32
    return %c0_i32, %c0_i32_0 : i32, i32
  }
  func.func @transform_3(%arg0: i32) -> (i32, i32) {
    %c0_i32 = arith.constant 0 : i32
    %c0_i32_0 = arith.constant 0 : i32
    return %arg0, %c0_i32 : i32, i32
  }
}

</mosaic_0001>

<bundles_post_ra>
// kernel: tpu_custom_call.1
= control target key start
LH: loop header
LB: loop body
LE: loop exit
PB: predicated region body
PF: predicated region fallthrough
CT: control target
= control target key end

     0   :  { %8 = vsyncpa [#allocation3], 0  ;;  %s1986_s0 = inlined_call_operand.hbm [shape: f32[512,256], index: 0, kind: input, shape index: {}]   ;;  %s1987_s1 = inlined_call_operand.hbm [shape: f32[256,256], index: 1, kind: input, shape index: {}]   ;;  %s1988_s2 = inlined_call_operand.hbm [shape: f32[128,128], index: 2, kind: input, shape index: {}]   ;;  %s1989_s3 = inlined_call_operand.hbm [shape: f32[512,128], index: 3, kind: output, shape index: {}]  }
   0x1   :  { %10 = vsyncpa [#allocation3 + $0x1], 0 }
   0x2   :  { %11 = vsyncpa [#allocation6], 0 }
   0x3   :  { %12 = vsyncpa [#allocation4], 0 }
   0x4   :  { %14 = vsyncpa [#allocation4 + $0x1], 0  ;;  %s1620_s12 = smov 0   ;;  %s1622_s13 = smov 0  }
   0x5   :  { %s1624_s14 = smov 0   ;;  %s1626_s15 = smov 0  }
   0x6 LB: > { %s1641_s16 = sadd.s32 4294967295, %s1588_s15   ;;  %s1081_s17 = sadd.s32 4294967294, %s1588_s15   ;;  %s1588_s15 = sphi %s1626_s15, %s2009_s15   ;;  %s1584_s14 = sphi %s1624_s14, %s2008_s14   ;;  %s1580_s13 = sphi %s1622_s13, %s2007_s13   ;;  %s1576_s12 = sphi %s1620_s12, %s2006_s12  }
   0x7   : > { %p40_p0 = scmp.ne.s32.totalorder %s1580_s13, %s1576_s12  ;;  %p1990_p1 = scmp.eq.s32.totalorder %s1641_s16, 0 }
   0x8   : > { %p112_p3 = scmp.eq.s32.totalorder %s1081_s17, 1  ;;  %p1082_p5 = scmp.ge.s32.totalorder %s1588_s15, 1 }
   0x9   : > { %p1650_p4 = por %p1990_p1, %p40_p0  ;;  %p119_p7 = scmp.lt.s32.totalorder %s1588_s15, 3 }
   0xa   : > { %p1655_p6 = por %p112_p3, %p40_p0  ;;  %s1590_s21 = smov [#allocation5]  }
   0xb   : > { %s1993_s18 = scalar_select %p1650_p4, 1, 0 }
   0xc   : > { %s1994_s19 = scalar_select %p1655_p6, 1, 0 }
   0xd   : > { %p1660_p8 = pnand %p1082_p5, %p119_p7  ;;  %s131_s22 = sshll.u32 %s1590_s21, 4  ;;  %s1664_s22 = int_to_ptr.vmem [resolvable:$true] %s131_s22 }
   0xe   : > { %s1591_s24 = smov [#allocation7]   ;;  %s1432_s28 = scalar_lea.hbm %s1987_s1, 8192 }
   0xf   : > { %p1371_p9 = pneg %p1660_p8  ;;  %s144_s25 = sshll.u32 %s1591_s24, 4  ;;  %s1675_s25 = int_to_ptr.vmem [resolvable:$true] %s144_s25 }
  0x10   : > { %p1433_p12 = scmp.ne.s32.totalorder %s1987_s1, %s1432_s28  ;;  %p1439_p5 = scmp.lt.u32.totalorder %s1432_s28, %s1987_s1 }
  0x11   : > { %p1671_p11 = pnand %p1371_p9, %p1990_p1 }
  0x13   : > { %p1434_p13 = pneg %p1671_p11 }
  0x15   : > { %p1435_p0 = pnand %p1434_p13, %p1433_p12 }
  0x17   : > { %p1436_p3 = pneg %p1435_p0 }
  0x19   : > { %p1441_p7 = pnand %p1439_p5, %p1436_p3 }
  0x1b   : > { %1444 = shalt.err (!%p1441_p7)
}
  0x1c   : > { %s1445_s6 = scalar_lea.vmem %s1664_s22, 8192  ;;  %p1453_p2 = scmp.lt.s32.totalorder %s1664_s22, %s1664_s22 }
  0x1d   : > { %p1446_p9 = scmp.ne.s32.totalorder %s1664_s22, %s1445_s6  ;;  %p1454_p12 = scmp.lt.s32.totalorder %s1445_s6, %s1445_s6 }
  0x1f   : > { %p1448_p10 = pnand %p1446_p9, %p1434_p13  ;;  %p1455_p0 = por %p1454_p12, %p1453_p2 }
  0x21   : > { %p1449_p1 = pneg %p1448_p10 }
  0x23   : > { %p1456_p6 = pnand %p1455_p0, %p1449_p1 }
  0x25   : > { %1459 = shalt.err (!%p1456_p6)
}
  0x26   : > { %s1592_s7 = smov 256   ;;  %s1593_s8 = smov 16  }
  0x27   : > { %1374 = dma.hbm_to_vmem [thread:$0]  (!%p1671_p11), %s1987_s1, 8192, %s1664_s22, [#allocation6], %s1592_s7, %s1592_s7, %s1593_s8  }
  0x28   : > { %s1460_s21 = scalar_lea.hbm %s1988_s2, 2048 }
  0x29   : > { %p1461_p1 = scmp.ne.s32.totalorder %s1988_s2, %s1460_s21  ;;  %p1467_p10 = scmp.lt.u32.totalorder %s1460_s21, %s1988_s2 }
  0x2b   : > { %p1463_p2 = pnand %p1461_p1, %p1434_p13 }
  0x2d   : > { %p1464_p6 = pneg %p1463_p2 }
  0x2f   : > { %p1469_p3 = pnand %p1467_p10, %p1464_p6 }
  0x31   : > { %1472 = shalt.err (!%p1469_p3)
}
  0x32   : > { %s1473_s22 = scalar_lea.vmem %s1675_s25, 2048  ;;  %p1481_p12 = scmp.lt.s32.totalorder %s1675_s25, %s1675_s25 }
  0x33   : > { %p1474_p5 = scmp.ne.s32.totalorder %s1675_s25, %s1473_s22  ;;  %p1482_p0 = scmp.lt.s32.totalorder %s1473_s22, %s1473_s22 }
  0x35   : > { %p1476_p7 = pnand %p1474_p5, %p1434_p13  ;;  %p1483_p1 = por %p1482_p0, %p1481_p12 }
  0x37   : > { %p1477_p9 = pneg %p1476_p7 }
  0x39   : > { %p1484_p2 = pnand %p1483_p1, %p1477_p9 }
  0x3b   : > { %1487 = shalt.err (!%p1484_p2)
}
  0x3c   : > { %s1594_s29 = smov 128   ;;  %s1595_s30 = smov 8  }
  0x3d   : > { %1377 = dma.hbm_to_vmem [thread:$0]  (!%p1671_p11), %s1988_s2, 2048, %s1675_s25, [#allocation6], %s1594_s29, %s1594_s29, %s1595_s30  }
  0x3e   : > { %s1733_s6 = sadd.s32 1, %s1588_s15   ;;  %s27_s10 = sadd.s32 1, %s1584_s14 }
  0x3f   : > { %s24_s9 = ssub.s32 %s1588_s15, %s1733_s6  ;;  %p34_p6 = scmp.ne.s32.totalorder %s1584_s14, %s1580_s13 }
  0x40   : > { %p25_p13 = scmp.eq.s32.totalorder %s24_s9, 0  ;;  %p35_p10 = scmp.eq.s32.totalorder %s1588_s15, 0 }
  0x41   : > { %p1997_p5 = scmp.eq.s32.totalorder %s1641_s16, 1  ;;  %p1388_p9 = scmp.lt.s32.totalorder %s1588_s15, 2 }
  0x42   : > { %s1742_s11 = scalar_select %p25_p13, %s1584_s14, %s27_s10  }
  0x43   : > { %p36_p3 = por %p35_p10, %p34_p6  ;;  %p1746_p7 = por %p1997_p5, %p34_p6 }
  0x44   : > { %s158_s23 = sand.u32 1, %s1584_s14   ;;  %s1101_s25 = sshll.u32 %s1588_s15, 13 }
  0x45   : > { %s1998_s17 = scalar_select %p1746_p7, 1, 0 }
  0x46   : > { %s1086_s21 = sshll.u32 %s158_s23, 9  ;;  %s1756_s27 = scalar_lea.hbm %s1986_s0, %s1101_s25 }
  0x47   : > { %s162_s28 = scalar_lea.vmem [#allocation2], %s1086_s21  ;;  %p1760_p11 = pnand %p1388_p9, %p36_p3 }
  0x48   : > { %s170_s22 = sshll.u32 %s162_s28, 4  ;;  %s1764_s30 = scalar_lea.sflag [#allocation3], %s158_s23  ;;  %s1758_s22 = int_to_ptr.vmem [resolvable:$true] %s170_s22 }
  0x49   : > { %s1488_s4 = scalar_lea.hbm %s1756_s27, 8192  ;;  %p1490_p0 = pneg %p1760_p11 }
  0x4a   : > { %p1489_p12 = scmp.ne.s32.totalorder %s1756_s27, %s1488_s4  ;;  %s1493_s10 = scalar_lea.hbm %s1986_s0, 16384 }
  0x4b   : > { %p1494_p13 = scmp.lt.u32.totalorder %s1756_s27, %s1986_s0  ;;  %p1495_p6 = scmp.lt.u32.totalorder %s1493_s10, %s1488_s4 }
  0x4c   : > { %p1491_p1 = pnand %p1490_p0, %p1489_p12  ;;  %p1497_p3 = scmp.lt.u32.totalorder %s1488_s4, %s1756_s27 }
  0x4d   : > { %p1496_p10 = por %p1495_p6, %p1494_p13 }
  0x4e   : > { %p1492_p2 = pneg %p1491_p1 }
  0x4f   : > { %p1498_p5 = por %p1497_p3, %p1496_p10 }
  0x51   : > { %p1499_p9 = pnand %p1498_p5, %p1492_p2 }
  0x53   : > { %1502 = shalt.err (!%p1499_p9)
}
  0x54   : > { %s1503_s23 = scalar_lea.vmem %s1758_s22, 8192  ;;  %s1596_s24 = smov [#allocation2]  }
  0x55   : > { %p1504_p12 = scmp.ne.s32.totalorder %s1758_s22, %s1503_s23  ;;  %s1508_s26 = sshll.u32 %s1596_s24, 4  ;;  %s1509_s26 = int_to_ptr.vmem [resolvable:$false] %s1508_s26 }
  0x56   : > { %s1510_s28 = scalar_lea.vmem %s1509_s26, 16384  ;;  %p1511_p4 = scmp.lt.s32.totalorder %s1758_s22, %s1509_s26 }
  0x57   : > { %p1506_p1 = pnand %p1504_p12, %p1490_p0  ;;  %p1512_p13 = scmp.lt.s32.totalorder %s1510_s28, %s1503_s23 }
  0x59   : > { %p1507_p7 = pneg %p1506_p1  ;;  %p1513_p6 = por %p1512_p13, %p1511_p4 }
  0x5b   : > { %p1514_p10 = pnand %p1513_p6, %p1507_p7 }
  0x5d   : > { %1517 = shalt.err (!%p1514_p10)
}
  0x5e   : > { %1381 = dma.hbm_to_vmem [thread:$0]  (!%p1760_p11), %s1756_s27, 8192, %s1758_s22, %s1764_s30, %s1592_s7, %s1592_s7, %s1593_s8  }
  0x5f   : > { %182 = sbr.rel (%p1660_p8) target bundleno = 726 (0x2d6), region = 32  ;;  %s1798_s4 = sand.u32 (!%p1660_p8), 1, %s1580_s13  }
  0x60   : > { %s1091_s5 = sshll.u32 (!%p1660_p8), %s1798_s4, 9  ;;  %s185_s9 = scalar_lea.sflag (!%p1660_p8), [#allocation3], %s1798_s4 }
  0x61   : > { %s1802_s10 = scalar_lea.vmem (!%p1660_p8), [#allocation2], %s1091_s5  ;;  %p2000_p4 = scmp.ne.s32.totalorder (!%p1660_p8), %s1993_s18, 0 }
  0x66   : > { %1563 = dma.done.wait (%p2000_p4), %s185_s9, 8192  }
  0x67   : > { %1565 = vsyncadd (%p2000_p4), %s185_s9, 4294959104  ;;  %p2001_p7 = scmp.eq.s32.totalorder %s1641_s16, 0 }
  0x69   : > { %1567 = dma.done.wait (%p2001_p7), [#allocation6], 10240   ;;  %p2002_p8 = pmov %p2001_p7 }
  0x6a   : > { %v286_v0 = vld [vmem:[#allocation5 + $0x8] sm:$0xff]  ;;  %v288_v1 = vld [vmem:[#allocation5 + $0x18] sm:$0xff]  ;;  %v285_v2 = vld [vmem:[#allocation5] sm:$0xff]  ;;  %s1094_s18 = sshll.u32 %s1798_s4, 8  ;;  %s1102_s7 = sshll.u32 %s1641_s16, 12 }
  0x6b   : > { %1569 = vsyncadd (%p2002_p8), [#allocation6], 4294957056  ;;  %v1231_v3 = vpack.c.bf16 %v288_v1, %v286_v0  ;;  %v287_v4 = vld [vmem:[#allocation5 + $0x10] sm:$0xff]  ;;  %v290_v5 = vld [vmem:[#allocation5 + $0x28] sm:$0xff]  ;;  %s1901_s20 = scalar_lea.vmem [#allocation8], %s1094_s18  ;;  %s1938_s29 = scalar_lea.hbm %s1989_s3, %s1102_s7 }
  0x6c   : > { %v292_v6 = vld [vmem:[#allocation5 + $0x38] sm:$0xff]  ;;  %v1233_v7 = vpack.c.bf16 %v287_v4, %v285_v2  ;;  %v289_v9 = vld [vmem:[#allocation5 + $0x20] sm:$0xff]  ;;  %v291_v10 = vld [vmem:[#allocation5 + $0x30] sm:$0xff]  ;;  %s989_s8 = sshll.u32 %s1901_s20, 4  ;;  %s976_s30 = scalar_lea.sflag [#allocation4], %s1798_s4  ;;  %s1940_s8 = int_to_ptr.vmem [resolvable:$true] %s989_s8 }
  0x6d   : > { %v1235_v8 = vpack.c.bf16 %v292_v6, %v290_v5  ;;  %v294_v11 = vld [vmem:[#allocation5 + $0x48] sm:$0xff]  ;;  %1232 = vmatprep.subr.bf16.mxu0 %v1231_v3  ;;  %v296_v12 = vld [vmem:[#allocation5 + $0x58] sm:$0xff]  ;;  %1327 = vmatprep.subr.bf16.mxu1 %v1231_v3  ;;  %v1237_v13 = vpack.c.bf16 %v291_v10, %v289_v9  ;;  %v293_v15 = vld [vmem:[#allocation5 + $0x40] sm:$0xff]  ;;  %s1518_s16 = scalar_lea.vmem %s1940_s8, 4096  ;;  %p2003_p0 = scmp.ne.s32.totalorder %s1998_s17, 0 }
  0x6e   : > { %1234 = vmatpush1.bf16.msra.mxu0 %v1233_v7  ;;  %1343 = vmatpush1.bf16.msra.mxu1 %v1233_v7  ;;  %v1239_v14 = vpack.c.bf16 %v296_v12, %v294_v11  ;;  %v295_v16 = vld [vmem:[#allocation5 + $0x50] sm:$0xff]  ;;  %v298_v17 = vld [vmem:[#allocation5 + $0x68] sm:$0xff]  ;;  %v300_v18 = vld [vmem:[#allocation5 + $0x78] sm:$0xff]  ;;  %p1519_p11 = scmp.ne.s32.totalorder %s1940_s8, %s1518_s16  ;;  %s1597_s21 = smov [#allocation8]  }
  0x6f   : > { %1236 = vmatprep.subr.bf16.mxu0 %v1235_v8  ;;  %1328 = vmatprep.subr.bf16.mxu1 %v1235_v8  ;;  %v1241_v19 = vpack.c.bf16 %v295_v16, %v293_v15  ;;  %v1243_v20 = vpack.c.bf16 %v300_v18, %v298_v17  ;;  %v297_v21 = vld [vmem:[#allocation5 + $0x60] sm:$0xff]  ;;  %v299_v22 = vld [vmem:[#allocation5 + $0x70] sm:$0xff]  ;;  %v302_v23 = vld [vmem:[#allocation5 + $0x88] sm:$0xff]  ;;  %s1522_s25 = sshll.u32 %s1597_s21, 4  ;;  %s1523_s25 = int_to_ptr.vmem [resolvable:$false] %s1522_s25 }
  0x70   : > { %v304_v24 = vld [vmem:[#allocation5 + $0x98] sm:$0xff]  ;;  %v1245_v25 = vpack.c.bf16 %v299_v22, %v297_v21  ;;  %v301_v27 = vld [vmem:[#allocation5 + $0x80] sm:$0xff]  ;;  %v303_v28 = vld [vmem:[#allocation5 + $0x90] sm:$0xff]  ;;  %p1520_p2 = pnand %p1519_p11, %p2003_p0  ;;  %s1524_s23 = scalar_lea.vmem %s1523_s25, 8192 }
  0x71   : > { %v1247_v26 = vpack.c.bf16 %v304_v24, %v302_v23  ;;  %v306_v29 = vld [vmem:[#allocation5 + $0xa8] sm:$0xff]  ;;  %v308_v30 = vld [vmem:[#allocation5 + $0xb8] sm:$0xff]  ;;  %v1249_v31 = vpack.c.bf16 %v303_v28, %v301_v27  ;;  %v305_v33 = vld [vmem:[#allocation5 + $0xa0] sm:$0xff]  ;;  %p1525_p5 = scmp.lt.s32.totalorder %s1940_s8, %s1523_s25  ;;  %p1526_p9 = scmp.lt.s32.totalorder %s1524_s23, %s1518_s16 }
  0x72   : > { %1238 = vmatpush1.bf16.msra.mxu0 %v1237_v13  ;;  %1344 = vmatpush1.bf16.msra.mxu1 %v1237_v13  ;;  %v1251_v32 = vpack.c.bf16 %v308_v30, %v306_v29  ;;  %v307_v34 = vld [vmem:[#allocation5 + $0xb0] sm:$0xff]  ;;  %v310_v35 = vld [vmem:[#allocation5 + $0xc8] sm:$0xff]  ;;  %v312_v36 = vld [vmem:[#allocation5 + $0xd8] sm:$0xff]  ;;  %p1521_p3 = pneg %p1520_p2 }
  0x73   : > { %1240 = vmatprep.subr.bf16.mxu0 %v1239_v14  ;;  %1329 = vmatprep.subr.bf16.mxu1 %v1239_v14  ;;  %v1253_v37 = vpack.c.bf16 %v307_v34, %v305_v33  ;;  %v1255_v38 = vpack.c.bf16 %v312_v36, %v310_v35  ;;  %v309_v39 = vld [vmem:[#allocation5 + $0xc0] sm:$0xff]  ;;  %v311_v40 = vld [vmem:[#allocation5 + $0xd0] sm:$0xff]  ;;  %v222_v41 = vld [vmem:[%s1802_s10 + $0x8] sm:$0xff]  ;;  %p1527_p12 = por %p1526_p9, %p1525_p5 }
  0x74   : > { %v314_v42 = vld [vmem:[#allocation5 + $0xe8] sm:$0xff]  ;;  %v316_v43 = vld [vmem:[#allocation5 + $0xf8] sm:$0xff]  ;;  %413 = vmatprep.mubr.f32.mxu0 %v222_v41  ;;  %v1257_v44 = vpack.c.bf16 %v311_v40, %v309_v39  ;;  %v313_v46 = vld [vmem:[#allocation5 + $0xe0] sm:$0xff] }
  0x75   : > { %v1259_v45 = vpack.c.bf16 %v316_v43, %v314_v42  ;;  %v315_v47 = vld [vmem:[#allocation5 + $0xf0] sm:$0xff]  ;;  %v318_v48 = vld [vmem:[#allocation5 + $0x108] sm:$0xff]  ;;  %v320_v49 = vld [vmem:[#allocation5 + $0x118] sm:$0xff]  ;;  %p1528_p1 = pnand %p1527_p12, %p1521_p3 }
  0x76   : > { %1242 = vmatpush1.bf16.msra.mxu0 %v1241_v19  ;;  %1345 = vmatpush1.bf16.msra.mxu1 %v1241_v19  ;;  %v1261_v50 = vpack.c.bf16 %v315_v47, %v313_v46  ;;  %v1263_v51 = vpack.c.bf16 %v320_v49, %v318_v48  ;;  %v317_v52 = vld [vmem:[#allocation5 + $0x100] sm:$0xff]  ;;  %v319_v53 = vld [vmem:[#allocation5 + $0x110] sm:$0xff]  ;;  %v322_v54 = vld [vmem:[#allocation5 + $0x128] sm:$0xff] }
  0x77   : > { %1244 = vmatprep.subr.bf16.mxu0 %v1243_v20  ;;  %1330 = vmatprep.subr.bf16.mxu1 %v1243_v20  ;;  %v324_v55 = vld [vmem:[#allocation5 + $0x138] sm:$0xff]  ;;  %v1265_v56 = vpack.c.bf16 %v319_v53, %v317_v52  ;;  %v321_v58 = vld [vmem:[#allocation5 + $0x120] sm:$0xff]  ;;  %v323_v59 = vld [vmem:[#allocation5 + $0x130] sm:$0xff] }
  0x78   : > { %v1267_v57 = vpack.c.bf16 %v324_v55, %v322_v54  ;;  %v326_v60 = vld [vmem:[#allocation5 + $0x148] sm:$0xff]  ;;  %v328_v61 = vld [vmem:[#allocation5 + $0x158] sm:$0xff]  ;;  %v1269_v63 = vpack.c.bf16 %v323_v59, %v321_v58  ;;  %v325_v1 = vld [vmem:[#allocation5 + $0x140] sm:$0xff] }
  0x79   : > { %v270_v62 = vld [vmem:[%s1802_s10 + $0x188] sm:$0xff]  ;;  %v1271_v0 = vpack.c.bf16 %v328_v61, %v326_v60  ;;  %v327_v2 = vld [vmem:[#allocation5 + $0x150] sm:$0xff]  ;;  %v332_v4 = vld [vmem:[#allocation5 + $0x178] sm:$0xff] }
  0x7a   : > { %1246 = vmatpush1.bf16.msra.mxu0 %v1245_v25  ;;  %1346 = vmatpush1.bf16.msra.mxu1 %v1245_v25  ;;  %v330_v3 = vld [vmem:[#allocation5 + $0x168] sm:$0xff]  ;;  %v1273_v5 = vpack.c.bf16 %v327_v2, %v325_v1  ;;  %v329_v7 = vld [vmem:[#allocation5 + $0x160] sm:$0xff]  ;;  %v331_v8 = vld [vmem:[#allocation5 + $0x170] sm:$0xff] }
  0x7b   : > { %1248 = vmatprep.subr.bf16.mxu0 %v1247_v26  ;;  %1331 = vmatprep.subr.bf16.mxu1 %v1247_v26  ;;  %v1275_v6 = vpack.c.bf16 %v332_v4, %v330_v3  ;;  %v334_v9 = vld [vmem:[#allocation5 + $0x188] sm:$0xff]  ;;  %v336_v10 = vld [vmem:[#allocation5 + $0x198] sm:$0xff]  ;;  %v1277_v11 = vpack.c.bf16 %v331_v8, %v329_v7  ;;  %v333_v13 = vld [vmem:[#allocation5 + $0x180] sm:$0xff] }
  0x7c   : > { %557 = vmatprep.mubr.f32.mxu1 %v270_v62  ;;  %v1279_v12 = vpack.c.bf16 %v336_v10, %v334_v9  ;;  %v335_v14 = vld [vmem:[#allocation5 + $0x190] sm:$0xff]  ;;  %v338_v15 = vld [vmem:[#allocation5 + $0x1a8] sm:$0xff]  ;;  %v340_v16 = vld [vmem:[#allocation5 + $0x1b8] sm:$0xff] }
  0x7d   : > { %v1281_v17 = vpack.c.bf16 %v335_v14, %v333_v13  ;;  %v1283_v18 = vpack.c.bf16 %v340_v16, %v338_v15  ;;  %v337_v19 = vld [vmem:[#allocation5 + $0x1a0] sm:$0xff]  ;;  %v339_v20 = vld [vmem:[#allocation5 + $0x1b0] sm:$0xff]  ;;  %v342_v21 = vld [vmem:[#allocation5 + $0x1c8] sm:$0xff] }
  0x7e   : > { %1250 = vmatpush1.bf16.msra.mxu0 %v1249_v31  ;;  %1347 = vmatpush1.bf16.msra.mxu1 %v1249_v31  ;;  %v344_v22 = vld [vmem:[#allocation5 + $0x1d8] sm:$0xff]  ;;  %v1285_v23 = vpack.c.bf16 %v339_v20, %v337_v19  ;;  %v341_v25 = vld [vmem:[#allocation5 + $0x1c0] sm:$0xff]  ;;  %v343_v26 = vld [vmem:[#allocation5 + $0x1d0] sm:$0xff] }
  0x7f   : > { %1252 = vmatprep.subr.bf16.mxu0 %v1251_v32  ;;  %1332 = vmatprep.subr.bf16.mxu1 %v1251_v32  ;;  %v1287_v24 = vpack.c.bf16 %v344_v22, %v342_v21  ;;  %v346_v27 = vld [vmem:[#allocation5 + $0x1e8] sm:$0xff]  ;;  %v348_v28 = vld [vmem:[#allocation5 + $0x1f8] sm:$0xff]  ;;  %v1289_v29 = vpack.c.bf16 %v343_v26, %v341_v25  ;;  %v345_v31 = vld [vmem:[#allocation5 + $0x1e0] sm:$0xff] }
  0x80   : > { %v1291_v30 = vpack.c.bf16 %v348_v28, %v346_v27  ;;  %v347_v32 = vld [vmem:[#allocation5 + $0x1f0] sm:$0xff]  ;;  %v702_v33 = vld [vmem:[#allocation7] sm:$0xff]  ;;  %v703_v34 = vld [vmem:[#allocation7 + $0x8] sm:$0xff] }
  0x81   : > { %v1293_v35 = vpack.c.bf16 %v347_v32, %v345_v31  ;;  %v1295_v36 = vpack.c.bf16 %v703_v34, %v702_v33  ;;  %v221_v39 = vld [vmem:[%s1802_s10] sm:$0xff]  ;;  %v224_v41 = vld [vmem:[%s1802_s10 + $0x18] sm:$0xff]  ;;  %v223_v46 = vld [vmem:[%s1802_s10 + $0x10] sm:$0xff] }
  0x82   : > { %1254 = vmatpush1.bf16.msra.mxu0 %v1253_v37  ;;  %1348 = vmatpush1.bf16.msra.mxu1 %v1253_v37  ;;  %v704_v37 = vld [vmem:[#allocation7 + $0x10] sm:$0xff]  ;;  %v269_v40 = vld [vmem:[%s1802_s10 + $0x180] sm:$0xff]  ;;  %v272_v42 = vld [vmem:[%s1802_s10 + $0x198] sm:$0xff] }
  0x83   : > { %1256 = vmatprep.subr.bf16.mxu0 %v1255_v38  ;;  %1333 = vmatprep.subr.bf16.mxu1 %v1255_v38  ;;  %v705_v38 = vld [vmem:[#allocation7 + $0x18] sm:$0xff]  ;;  %v271_v47 = vld [vmem:[%s1802_s10 + $0x190] sm:$0xff]  ;;  %v226_v48 = vld [vmem:[%s1802_s10 + $0x28] sm:$0xff] }
  0x84   : > { %v1299_v43 = vpack.c.bf16 %v705_v38, %v704_v37  ;;  %v274_v49 = vld [vmem:[%s1802_s10 + $0x1a8] sm:$0xff]  ;;  %v709_v52 = vld [vmem:[#allocation7 + $0x38] sm:$0xff]  ;;  %v225_v53 = vld [vmem:[%s1802_s10 + $0x20] sm:$0xff] }
  0x85   : > { %v273_v54 = vld [vmem:[%s1802_s10 + $0x1a0] sm:$0xff]  ;;  %v228_v55 = vld [vmem:[%s1802_s10 + $0x38] sm:$0xff]  ;;  %v711_v59 = vld [vmem:[#allocation7 + $0x48] sm:$0xff] }
  0x86   : > { %1258 = vmatpush1.bf16.msra.mxu0 %v1257_v44  ;;  %1349 = vmatpush1.bf16.msra.mxu1 %v1257_v44  ;;  %v706_v44 = vld [vmem:[#allocation7 + $0x20] sm:$0xff]  ;;  %v227_v60 = vld [vmem:[%s1802_s10 + $0x30] sm:$0xff]  ;;  %v230_v62 = vld [vmem:[%s1802_s10 + $0x48] sm:$0xff] }
  0x87   : > { %1260 = vmatprep.subr.bf16.mxu0 %v1259_v45  ;;  %1334 = vmatprep.subr.bf16.mxu1 %v1259_v45  ;;  %v707_v45 = vld [vmem:[#allocation7 + $0x28] sm:$0xff]  ;;  %v710_v58 = vld [vmem:[#allocation7 + $0x40] sm:$0xff]  ;;  %v275_v61 = vld [vmem:[%s1802_s10 + $0x1b0] sm:$0xff] }
  0x88   : > { %v712_v1 = vld [vmem:[#allocation7 + $0x50] sm:$0xff]  ;;  %v713_v2 = vld [vmem:[#allocation7 + $0x58] sm:$0xff]  ;;  %v229_v3 = vld [vmem:[%s1802_s10 + $0x40] sm:$0xff] }
  0x89   : > { %v277_v4 = vld [vmem:[%s1802_s10 + $0x1c0] sm:$0xff]  ;;  %v1315_v7 = vpack.c.bf16 %v713_v2, %v712_v1  ;;  %v231_v8 = vld [vmem:[%s1802_s10 + $0x50] sm:$0xff]  ;;  %v234_v10 = vld [vmem:[%s1802_s10 + $0x68] sm:$0xff] }
  0x8a   : > { %1262 = vmatpush1.bf16.msra.mxu0 %v1261_v50  ;;  %1350 = vmatpush1.bf16.msra.mxu1 %v1261_v50  ;;  %v1303_v50 = vpack.c.bf16 %v707_v45, %v706_v44  ;;  %v279_v9 = vld [vmem:[%s1802_s10 + $0x1d0] sm:$0xff]  ;;  %v281_v13 = vld [vmem:[%s1802_s10 + $0x1e0] sm:$0xff]  ;;  %v236_v14 = vld [vmem:[%s1802_s10 + $0x78] sm:$0xff] }
  0x8b   : > { %1264 = vmatprep.subr.bf16.mxu0 %v1263_v51  ;;  %1335 = vmatprep.subr.bf16.mxu1 %v1263_v51  ;;  %v708_v51 = vld [vmem:[#allocation7 + $0x30] sm:$0xff]  ;;  %v284_v15 = vld [vmem:[%s1802_s10 + $0x1f8] sm:$0xff]  ;;  %v237_v19 = vld [vmem:[%s1802_s10 + $0x80] sm:$0xff] }
  0x8c   : > { %v235_v16 = vld [vmem:[%s1802_s10 + $0x70] sm:$0xff]  ;;  %v240_v20 = vld [vmem:[%s1802_s10 + $0x98] sm:$0xff]  ;;  %v242_v22 = vld [vmem:[%s1802_s10 + $0xa8] sm:$0xff] }
  0x8d   : > { %v239_v21 = vld [vmem:[%s1802_s10 + $0x90] sm:$0xff]  ;;  %v246_v26 = vld [vmem:[%s1802_s10 + $0xc8] sm:$0xff]  ;;  %v245_v27 = vld [vmem:[%s1802_s10 + $0xc0] sm:$0xff] }
  0x8e   : > { %1266 = vmatpush1.bf16.msra.mxu0 %v1265_v56  ;;  %1351 = vmatpush1.bf16.msra.mxu1 %v1265_v56  ;;  %v276_v56 = vld [vmem:[%s1802_s10 + $0x1b8] sm:$0xff]  ;;  %v243_v25 = vld [vmem:[%s1802_s10 + $0xb0] sm:$0xff]  ;;  %v249_v31 = vld [vmem:[%s1802_s10 + $0xe0] sm:$0xff] }
  0x8f   : > { %1268 = vmatprep.subr.bf16.mxu0 %v1267_v57  ;;  %1336 = vmatprep.subr.bf16.mxu1 %v1267_v57  ;;  %v1307_v57 = vpack.c.bf16 %v709_v52, %v708_v51  ;;  %v248_v28 = vld [vmem:[%s1802_s10 + $0xd8] sm:$0xff]  ;;  %v251_v33 = vld [vmem:[%s1802_s10 + $0xf0] sm:$0xff]  ;;  %v254_v34 = vld [vmem:[%s1802_s10 + $0x108] sm:$0xff] }
  0x90   : > { %v252_v32 = vld [vmem:[%s1802_s10 + $0xf8] sm:$0xff]  ;;  %v255_v37 = vld [vmem:[%s1802_s10 + $0x110] sm:$0xff]  ;;  %v258_v38 = vld [vmem:[%s1802_s10 + $0x128] sm:$0xff] }
  0x91   : > { %v264_v44 = vld [vmem:[%s1802_s10 + $0x158] sm:$0xff]  ;;  %v263_v45 = vld [vmem:[%s1802_s10 + $0x150] sm:$0xff] }
  0x92   : > { %1270 = vmatpush1.bf16.msra.mxu0 %v1269_v63  ;;  %1352 = vmatpush1.bf16.msra.mxu1 %v1269_v63  ;;  %v278_v63 = vld [vmem:[%s1802_s10 + $0x1c8] sm:$0xff]  ;;  %v268_v51 = vld [vmem:[%s1802_s10 + $0x178] sm:$0xff]  ;;  %v716_v52 = vld [vmem:[#allocation7 + $0x70] sm:$0xff] }
  0x93   : > { %1272 = vmatprep.subr.bf16.mxu0 %v1271_v0  ;;  %1337 = vmatprep.subr.bf16.mxu1 %v1271_v0  ;;  %v1311_v0 = vpack.c.bf16 %v711_v59, %v710_v58 }
  0x96   : > { %1274 = vmatpush1.bf16.msra.mxu0 %v1273_v5  ;;  %1353 = vmatpush1.bf16.msra.mxu1 %v1273_v5  ;;  %v232_v5 = vld [vmem:[%s1802_s10 + $0x58] sm:$0xff] }
  0x97   : > { %1276 = vmatprep.subr.bf16.mxu0 %v1275_v6  ;;  %1338 = vmatprep.subr.bf16.mxu1 %v1275_v6  ;;  %v280_v6 = vld [vmem:[%s1802_s10 + $0x1d8] sm:$0xff] }
  0x9a   : > { %1278 = vmatpush1.bf16.msra.mxu0 %v1277_v11  ;;  %1354 = vmatpush1.bf16.msra.mxu1 %v1277_v11  ;;  %v282_v11 = vld [vmem:[%s1802_s10 + $0x1e8] sm:$0xff] }
  0x9b   : > { %1280 = vmatprep.subr.bf16.mxu0 %v1279_v12  ;;  %1339 = vmatprep.subr.bf16.mxu1 %v1279_v12  ;;  %v233_v12 = vld [vmem:[%s1802_s10 + $0x60] sm:$0xff] }
  0x9e   : > { %1282 = vmatpush1.bf16.msra.mxu0 %v1281_v17  ;;  %1355 = vmatpush1.bf16.msra.mxu1 %v1281_v17  ;;  %v283_v17 = vld [vmem:[%s1802_s10 + $0x1f0] sm:$0xff] }
  0x9f   : > { %1284 = vmatprep.subr.bf16.mxu0 %v1283_v18  ;;  %1340 = vmatprep.subr.bf16.mxu1 %v1283_v18  ;;  %v238_v18 = vld [vmem:[%s1802_s10 + $0x88] sm:$0xff] }
  0xa2   : > { %1286 = vmatpush1.bf16.msra.mxu0 %v1285_v23  ;;  %1356 = vmatpush1.bf16.msra.mxu1 %v1285_v23  ;;  %v241_v23 = vld [vmem:[%s1802_s10 + $0xa0] sm:$0xff] }
  0xa3   : > { %1288 = vmatprep.subr.bf16.mxu0 %v1287_v24  ;;  %1341 = vmatprep.subr.bf16.mxu1 %v1287_v24  ;;  %v244_v24 = vld [vmem:[%s1802_s10 + $0xb8] sm:$0xff] }
  0xa6   : > { %1290 = vmatpush1.bf16.msra.mxu0 %v1289_v29  ;;  %1357 = vmatpush1.bf16.msra.mxu1 %v1289_v29  ;;  %v247_v29 = vld [vmem:[%s1802_s10 + $0xd0] sm:$0xff] }
  0xa7   : > { %1292 = vmatprep.subr.bf16.mxu0 %v1291_v30  ;;  %1342 = vmatprep.subr.bf16.mxu1 %v1291_v30  ;;  %v250_v30 = vld [vmem:[%s1802_s10 + $0xe8] sm:$0xff] }
  0xaa   : > { %1294 = vmatpush1.bf16.msra.mxu0 %v1293_v35  ;;  %1358 = vmatpush1.bf16.msra.mxu1 %v1293_v35  ;;  %v253_v35 = vld [vmem:[%s1802_s10 + $0x100] sm:$0xff] }
  0xab   : > { %1296 = vmatprep.subr.bf16.mxu1 %v1295_v36 }
  0xad   : > { %414 = vmatmul.mubr.f32.vlgmr.msra.gmra.mrb[0].mxu0 %v221_v39  ;;  %558 = vmatmul.mubr.f32.vlgmr.msra.gmra.mrb[0].mxu1 %v269_v40  ;;  %v257_v39 = vld [vmem:[%s1802_s10 + $0x120] sm:$0xff]  ;;  %v260_v40 = vld [vmem:[%s1802_s10 + $0x138] sm:$0xff] }
  0xae   : > { %419 = vmatprep.mubr.f32.mxu0 %v224_v41  ;;  %563 = vmatprep.mubr.f32.mxu1 %v272_v42  ;;  %v259_v41 = vld [vmem:[%s1802_s10 + $0x130] sm:$0xff]  ;;  %v262_v42 = vld [vmem:[%s1802_s10 + $0x148] sm:$0xff] }
  0xaf   : > { %1298 = vmatpush3.bf16.msra.mxu1 %v1295_v36  ;;  %v256_v36 = vld [vmem:[%s1802_s10 + $0x118] sm:$0xff] }
  0xb0   : > { %1300 = vmatprep.subr.bf16.mxu1 %v1299_v43 }
  0xb1   : > { %420 = vmatmul.mubr.f32.gmra.mrb[2].mxu0 %v223_v46  ;;  %564 = vmatmul.mubr.f32.gmra.mrb[2].mxu1 %v271_v47  ;;  %v266_v46 = vld [vmem:[%s1802_s10 + $0x168] sm:$0xff]  ;;  %v714_v47 = vld [vmem:[#allocation7 + $0x60] sm:$0xff] }
  0xb2   : > { %425 = vmatprep.mubr.f32.mxu0 %v226_v48  ;;  %569 = vmatprep.mubr.f32.mxu1 %v274_v49  ;;  %v715_v48 = vld [vmem:[#allocation7 + $0x68] sm:$0xff] }
  0xb3   : > { %1302 = vmatpush3.bf16.msra.mxu1 %v1299_v43  ;;  %v261_v43 = vld [vmem:[%s1802_s10 + $0x140] sm:$0xff]  ;;  %v1319_v49 = vpack.c.bf16 %v715_v48, %v714_v47 }
  0xb4   : > { %1304 = vmatprep.subr.bf16.mxu1 %v1303_v50 }
  0xb5   : > { %426 = vmatmul.mubr.f32.gmra.mrb[4].mxu0 %v225_v53  ;;  %570 = vmatmul.mubr.f32.gmra.mrb[4].mxu1 %v273_v54  ;;  %v717_v53 = vld [vmem:[#allocation7 + $0x78] sm:$0xff] }
  0xb6   : > { %431 = vmatprep.mubr.f32.mxu0 %v228_v55  ;;  %575 = vmatprep.mubr.f32.mxu1 %v276_v56  ;;  %v1323_v54 = vpack.c.bf16 %v717_v53, %v716_v52  ;;  %v267_v55 = vld [vmem:[%s1802_s10 + $0x170] sm:$0xff] }
  0xb7   : > { %1306 = vmatpush3.bf16.msra.mxu1 %v1303_v50  ;;  %v265_v50 = vld [vmem:[%s1802_s10 + $0x160] sm:$0xff] }
  0xb8   : > { %1308 = vmatprep.subr.bf16.mxu1 %v1307_v57 }
  0xb9   : > { %432 = vmatmul.mubr.f32.gmra.mrb[6].mxu0 %v227_v60  ;;  %576 = vmatmul.mubr.f32.gmra.mrb[6].mxu1 %v275_v61 }
  0xba   : > { %437 = vmatprep.mubr.f32.mxu0 %v230_v62  ;;  %581 = vmatprep.mubr.f32.mxu1 %v278_v63 }
  0xbb   : > { %1310 = vmatpush3.bf16.msra.mxu1 %v1307_v57 }
  0xbc   : > { %1312 = vmatprep.subr.bf16.mxu1 %v1311_v0 }
  0xbd   : > { %438 = vmatmul.mubr.f32.gmra.mrb[8].mxu0 %v229_v3  ;;  %582 = vmatmul.mubr.f32.gmra.mrb[8].mxu1 %v277_v4 }
  0xbe   : > { %443 = vmatprep.mubr.f32.mxu0 %v232_v5  ;;  %587 = vmatprep.mubr.f32.mxu1 %v280_v6 }
  0xbf   : > { %1314 = vmatpush3.bf16.msra.mxu1 %v1311_v0 }
  0xc0   : > { %1316 = vmatprep.subr.bf16.mxu1 %v1315_v7 }
  0xc1   : > { %444 = vmatmul.mubr.f32.gmra.mrb[10].mxu0 %v231_v8  ;;  %588 = vmatmul.mubr.f32.gmra.mrb[10].mxu1 %v279_v9 }
  0xc2   : > { %449 = vmatprep.mubr.f32.mxu0 %v234_v10  ;;  %593 = vmatprep.mubr.f32.mxu1 %v282_v11 }
  0xc3   : > { %1318 = vmatpush3.bf16.msra.mxu1 %v1315_v7 }
  0xc4   : > { %1320 = vmatprep.subr.bf16.mxu1 %v1319_v49 }
  0xc5   : > { %450 = vmatmul.mubr.f32.gmra.mrb[12].mxu0 %v233_v12  ;;  %594 = vmatmul.mubr.f32.gmra.mrb[12].mxu1 %v281_v13 }
  0xc6   : > { %455 = vmatprep.mubr.f32.mxu0 %v236_v14  ;;  %599 = vmatprep.mubr.f32.mxu1 %v284_v15 }
  0xc7   : > { %1322 = vmatpush3.bf16.msra.mxu1 %v1319_v49 }
  0xc8   : > { %1324 = vmatprep.subr.bf16.mxu1 %v1323_v54 }
  0xc9   : > { %456 = vmatmul.mubr.f32.gmra.mrb[14].mxu0 %v235_v16  ;;  %600 = vmatmul.mubr.f32.gmra.mrb[14].mxu1 %v283_v17 }
  0xca   : > { %461 = vmatprep.mubr.f32.mxu0 %v238_v18 }
  0xcb   : > { %1326 = vmatpush3.bf16.msra.mxu1 %v1323_v54 }
  0xcd   : > { %462 = vmatmul.mubr.f32.gmra.mrb[16].mxu0 %v237_v19 }
  0xce   : > { %467 = vmatprep.mubr.f32.mxu0 %v240_v20 }
  0xd1   : > { %468 = vmatmul.mubr.f32.gmra.mrb[18].mxu0 %v239_v21 }
  0xd2   : > { %473 = vmatprep.mubr.f32.mxu0 %v242_v22 }
  0xd5   : > { %474 = vmatmul.mubr.f32.gmra.mrb[20].mxu0 %v241_v23 }
  0xd6   : > { %479 = vmatprep.mubr.f32.mxu0 %v244_v24 }
  0xd9   : > { %480 = vmatmul.mubr.f32.gmra.mrb[22].mxu0 %v243_v25 }
  0xda   : > { %485 = vmatprep.mubr.f32.mxu0 %v246_v26 }
  0xdd   : > { %486 = vmatmul.mubr.f32.gmra.mrb[24].mxu0 %v245_v27 }
  0xde   : > { %491 = vmatprep.mubr.f32.mxu0 %v248_v28 }
  0xe1   : > { %492 = vmatmul.mubr.f32.gmra.mrb[26].mxu0 %v247_v29 }
  0xe2   : > { %497 = vmatprep.mubr.f32.mxu0 %v250_v30 }
  0xe5   : > { %498 = vmatmul.mubr.f32.gmra.mrb[28].mxu0 %v249_v31 }
  0xe6   : > { %503 = vmatprep.mubr.f32.mxu0 %v252_v32 }
  0xe9   : > { %504 = vmatmul.mubr.f32.gmra.mrb[30].mxu0 %v251_v33 }
  0xea   : > { %509 = vmatprep.mubr.f32.mxu0 %v254_v34 }
  0xed   : > { %510 = vmatmul.mubr.f32.gmra.mrb[32].mxu0 %v253_v35 }
  0xee   : > { %515 = vmatprep.mubr.f32.mxu0 %v256_v36 }
  0xf1   : > { %516 = vmatmul.mubr.f32.gmra.mrb[34].mxu0 %v255_v37 }
  0xf2   : > { %521 = vmatprep.mubr.f32.mxu0 %v258_v38 }
  0xf5   : > { %522 = vmatmul.mubr.f32.gmra.mrb[36].mxu0 %v257_v39 }
  0xf6   : > { %527 = vmatprep.mubr.f32.mxu0 %v260_v40 }
  0xf9   : > { %528 = vmatmul.mubr.f32.gmra.mrb[38].mxu0 %v259_v41 }
  0xfa   : > { %533 = vmatprep.mubr.f32.mxu0 %v262_v42 }
  0xfd   : > { %534 = vmatmul.mubr.f32.gmra.mrb[40].mxu0 %v261_v43 }
  0xfe   : > { %539 = vmatprep.mubr.f32.mxu0 %v264_v44 }
 0x101   : > { %540 = vmatmul.mubr.f32.gmra.mrb[42].mxu0 %v263_v45 }
 0x102   : > { %545 = vmatprep.mubr.f32.mxu0 %v266_v46 }
 0x105   : > { %546 = vmatmul.mubr.f32.gmra.mrb[44].mxu0 %v265_v50 }
 0x106   : > { %551 = vmatprep.mubr.f32.mxu0 %v268_v51 }
 0x109   : > { %552 = vmatmul.mubr.f32.gmra.mrb[46].mxu0 %v267_v55 }
 0x180   : > { %v415_v56 = vpop.f32.mrb[0].mxu0  ;;  %v559_v57 = vpop.f32.mrb[0].mxu1 }
 0x181   : > { %v606_v58 = vmul.f32 %v415_v56, %v415_v56  ;;  %v417_v59 = vpop.f32.mrb[1].mxu0  ;;  %v630_v60 = vmul.f32 %v559_v57, %v559_v57  ;;  %v561_v61 = vpop.f32.mrb[1].mxu1 }
 0x182   : > { %v638_v62 = vmul.f32 %v417_v59, %v417_v59  ;;  %v662_v63 = vmul.f32 %v561_v61, %v561_v61 }
 0x184   : > { %v670_v0 = vadd.f32 %v638_v62, %v606_v58  ;;  %v421_v1 = vpop.f32.mrb[2].mxu0  ;;  %v1876_v2 = vadd.f32 %v662_v63, %v630_v60  ;;  %v565_v3 = vpop.f32.mrb[2].mxu1 }
 0x185   : > { %v607_v4 = vmul.f32 %v421_v1, %v421_v1  ;;  %v423_v5 = vpop.f32.mrb[3].mxu0  ;;  %v631_v6 = vmul.f32 %v565_v3, %v565_v3  ;;  %v567_v7 = vpop.f32.mrb[3].mxu1 }
 0x186   : > { %v639_v8 = vmul.f32 %v423_v5, %v423_v5  ;;  %1183 = vmatprep.mubr.f32.mxu1 %v670_v0  ;;  %v663_v9 = vmul.f32 %v567_v7, %v567_v7 }
 0x188   : > { %v671_v10 = vadd.f32 %v639_v8, %v607_v4  ;;  %v427_v11 = vpop.f32.mrb[4].mxu0  ;;  %v1878_v12 = vadd.f32 %v663_v9, %v631_v6  ;;  %v571_v13 = vpop.f32.mrb[4].mxu1 }
 0x189   : > { %v608_v14 = vmul.f32 %v427_v11, %v427_v11  ;;  %v429_v15 = vpop.f32.mrb[5].mxu0  ;;  %v632_v16 = vmul.f32 %v571_v13, %v571_v13  ;;  %v573_v17 = vpop.f32.mrb[5].mxu1 }
 0x18a   : > { %v640_v18 = vmul.f32 %v429_v15, %v429_v15  ;;  %1184 = vmatmul.mubr.f32.vlgmr.msra.gmra.mrb[16].mxu1 %v671_v10  ;;  %v664_v19 = vmul.f32 %v573_v17, %v573_v17 }
 0x18c   : > { %v672_v20 = vadd.f32 %v640_v18, %v608_v14  ;;  %v433_v21 = vpop.f32.mrb[6].mxu0  ;;  %v1880_v22 = vadd.f32 %v664_v19, %v632_v16  ;;  %v577_v23 = vpop.f32.mrb[6].mxu1 }
 0x18d   : > { %v609_v24 = vmul.f32 %v433_v21, %v433_v21  ;;  %v435_v25 = vpop.f32.mrb[7].mxu0  ;;  %v633_v26 = vmul.f32 %v577_v23, %v577_v23  ;;  %v579_v27 = vpop.f32.mrb[7].mxu1 }
 0x18e   : > { %v641_v28 = vmul.f32 %v435_v25, %v435_v25  ;;  %1186 = vmatprep.mubr.f32.mxu1 %v672_v20  ;;  %v665_v29 = vmul.f32 %v579_v27, %v579_v27 }
 0x190   : > { %v673_v30 = vadd.f32 %v641_v28, %v609_v24  ;;  %v439_v31 = vpop.f32.mrb[8].mxu0  ;;  %v1882_v32 = vadd.f32 %v665_v29, %v633_v26  ;;  %v583_v33 = vpop.f32.mrb[8].mxu1 }
 0x191   : > { %v610_v34 = vmul.f32 %v439_v31, %v439_v31  ;;  %v441_v35 = vpop.f32.mrb[9].mxu0  ;;  %v634_v36 = vmul.f32 %v583_v33, %v583_v33  ;;  %v585_v37 = vpop.f32.mrb[9].mxu1 }
 0x192   : > { %v642_v38 = vmul.f32 %v441_v35, %v441_v35  ;;  %1187 = vmatmul.mubr.f32.gmra.mrb[18].mxu1 %v673_v30  ;;  %v666_v39 = vmul.f32 %v585_v37, %v585_v37 }
 0x194   : > { %v674_v40 = vadd.f32 %v642_v38, %v610_v34  ;;  %v445_v41 = vpop.f32.mrb[10].mxu0  ;;  %v1884_v42 = vadd.f32 %v666_v39, %v634_v36  ;;  %v589_v43 = vpop.f32.mrb[10].mxu1 }
 0x195   : > { %v611_v44 = vmul.f32 %v445_v41, %v445_v41  ;;  %v447_v45 = vpop.f32.mrb[11].mxu0  ;;  %v635_v46 = vmul.f32 %v589_v43, %v589_v43  ;;  %v591_v47 = vpop.f32.mrb[11].mxu1 }
 0x196   : > { %v643_v48 = vmul.f32 %v447_v45, %v447_v45  ;;  %1189 = vmatprep.mubr.f32.mxu1 %v674_v40  ;;  %v667_v49 = vmul.f32 %v591_v47, %v591_v47 }
 0x198   : > { %v675_v50 = vadd.f32 %v643_v48, %v611_v44  ;;  %v451_v51 = vpop.f32.mrb[12].mxu0  ;;  %v1886_v52 = vadd.f32 %v667_v49, %v635_v46  ;;  %v595_v53 = vpop.f32.mrb[12].mxu1 }
 0x199   : > { %v612_v54 = vmul.f32 %v451_v51, %v451_v51  ;;  %v453_v55 = vpop.f32.mrb[13].mxu0  ;;  %v636_v56 = vmul.f32 %v595_v53, %v595_v53  ;;  %v597_v57 = vpop.f32.mrb[13].mxu1 }
 0x19a   : > { %v644_v58 = vmul.f32 %v453_v55, %v453_v55  ;;  %1190 = vmatmul.mubr.f32.gmra.mrb[20].mxu1 %v675_v50  ;;  %v668_v59 = vmul.f32 %v597_v57, %v597_v57 }
 0x19c   : > { %v676_v60 = vadd.f32 %v644_v58, %v612_v54  ;;  %v457_v61 = vpop.f32.mrb[14].mxu0  ;;  %v1888_v62 = vadd.f32 %v668_v59, %v636_v56  ;;  %v601_v63 = vpop.f32.mrb[14].mxu1 }
 0x19d   : > { %v613_v0 = vmul.f32 %v457_v61, %v457_v61  ;;  %v459_v1 = vpop.f32.mrb[15].mxu0  ;;  %v637_v3 = vmul.f32 %v601_v63, %v601_v63  ;;  %v603_v4 = vpop.f32.mrb[15].mxu1 }
 0x19e   : > { %v645_v5 = vmul.f32 %v459_v1, %v459_v1  ;;  %1192 = vmatprep.mubr.f32.mxu1 %v676_v60  ;;  %v669_v6 = vmul.f32 %v603_v4, %v603_v4 }
 0x1a0   : > { %v677_v7 = vadd.f32 %v645_v5, %v613_v0  ;;  %v463_v8 = vpop.f32.mrb[16].mxu0  ;;  %v1890_v9 = vadd.f32 %v669_v6, %v637_v3 }
 0x1a1   : > { %v614_v10 = vmul.f32 %v463_v8, %v463_v8  ;;  %v465_v11 = vpop.f32.mrb[17].mxu0 }
 0x1a2   : > { %v646_v13 = vmul.f32 %v465_v11, %v465_v11  ;;  %1193 = vmatmul.mubr.f32.gmra.mrb[22].mxu1 %v677_v7 }
 0x1a4   : > { %v678_v14 = vadd.f32 %v646_v13, %v614_v10  ;;  %v469_v15 = vpop.f32.mrb[18].mxu0 }
 0x1a5   : > { %v615_v16 = vmul.f32 %v469_v15, %v469_v15  ;;  %v471_v17 = vpop.f32.mrb[19].mxu0 }
 0x1a6   : > { %v647_v18 = vmul.f32 %v471_v17, %v471_v17  ;;  %1195 = vmatprep.mubr.f32.mxu1 %v678_v14 }
 0x1a8   : > { %v679_v19 = vadd.f32 %v647_v18, %v615_v16  ;;  %v475_v20 = vpop.f32.mrb[20].mxu0 }
 0x1a9   : > { %v616_v21 = vmul.f32 %v475_v20, %v475_v20  ;;  %v477_v23 = vpop.f32.mrb[21].mxu0 }
 0x1aa   : > { %v648_v24 = vmul.f32 %v477_v23, %v477_v23  ;;  %1196 = vmatmul.mubr.f32.gmra.mrb[24].mxu1 %v679_v19 }
 0x1ac   : > { %v680_v25 = vadd.f32 %v648_v24, %v616_v21  ;;  %v481_v26 = vpop.f32.mrb[22].mxu0 }
 0x1ad   : > { %v617_v27 = vmul.f32 %v481_v26, %v481_v26  ;;  %v483_v28 = vpop.f32.mrb[23].mxu0 }
 0x1ae   : > { %v649_v29 = vmul.f32 %v483_v28, %v483_v28  ;;  %1198 = vmatprep.mubr.f32.mxu1 %v680_v25 }
 0x1b0   : > { %v681_v30 = vadd.f32 %v649_v29, %v617_v27  ;;  %v487_v31 = vpop.f32.mrb[24].mxu0 }
 0x1b1   : > { %v618_v33 = vmul.f32 %v487_v31, %v487_v31  ;;  %v489_v34 = vpop.f32.mrb[25].mxu0 }
 0x1b2   : > { %v650_v35 = vmul.f32 %v489_v34, %v489_v34  ;;  %1199 = vmatmul.mubr.f32.gmra.mrb[26].mxu1 %v681_v30 }
 0x1b4   : > { %v682_v36 = vadd.f32 %v650_v35, %v618_v33  ;;  %v493_v37 = vpop.f32.mrb[26].mxu0 }
 0x1b5   : > { %v619_v38 = vmul.f32 %v493_v37, %v493_v37  ;;  %v495_v39 = vpop.f32.mrb[27].mxu0 }
 0x1b6   : > { %v651_v40 = vmul.f32 %v495_v39, %v495_v39  ;;  %1201 = vmatprep.mubr.f32.mxu1 %v682_v36 }
 0x1b8   : > { %v683_v41 = vadd.f32 %v651_v40, %v619_v38  ;;  %v499_v43 = vpop.f32.mrb[28].mxu0 }
 0x1b9   : > { %v620_v44 = vmul.f32 %v499_v43, %v499_v43  ;;  %v501_v45 = vpop.f32.mrb[29].mxu0 }
 0x1ba   : > { %v652_v46 = vmul.f32 %v501_v45, %v501_v45  ;;  %1202 = vmatmul.mubr.f32.gmra.mrb[28].mxu1 %v683_v41 }
 0x1bc   : > { %v684_v47 = vadd.f32 %v652_v46, %v620_v44  ;;  %v505_v48 = vpop.f32.mrb[30].mxu0 }
 0x1bd   : > { %v621_v49 = vmul.f32 %v505_v48, %v505_v48  ;;  %v507_v50 = vpop.f32.mrb[31].mxu0 }
 0x1be   : > { %v653_v51 = vmul.f32 %v507_v50, %v507_v50  ;;  %1204 = vmatprep.mubr.f32.mxu1 %v684_v47 }
 0x1c0   : > { %v685_v53 = vadd.f32 %v653_v51, %v621_v49  ;;  %v511_v54 = vpop.f32.mrb[32].mxu0 }
 0x1c1   : > { %v622_v55 = vmul.f32 %v511_v54, %v511_v54  ;;  %v513_v56 = vpop.f32.mrb[33].mxu0 }
 0x1c2   : > { %v654_v57 = vmul.f32 %v513_v56, %v513_v56  ;;  %1205 = vmatmul.mubr.f32.gmra.mrb[30].mxu1 %v685_v53 }
 0x1c4   : > { %v686_v58 = vadd.f32 %v654_v57, %v622_v55  ;;  %v517_v59 = vpop.f32.mrb[34].mxu0 }
 0x1c5   : > { %v623_v60 = vmul.f32 %v517_v59, %v517_v59  ;;  %v519_v61 = vpop.f32.mrb[35].mxu0 }
 0x1c6   : > { %v655_v63 = vmul.f32 %v519_v61, %v519_v61  ;;  %1207 = vmatprep.mubr.f32.mxu1 %v686_v58 }
 0x1c8   : > { %v687_v0 = vadd.f32 %v655_v63, %v623_v60  ;;  %v523_v1 = vpop.f32.mrb[36].mxu0 }
 0x1c9   : > { %v624_v3 = vmul.f32 %v523_v1, %v523_v1  ;;  %v525_v4 = vpop.f32.mrb[37].mxu0 }
 0x1ca   : > { %v656_v5 = vmul.f32 %v525_v4, %v525_v4  ;;  %1208 = vmatmul.mubr.f32.gmra.mrb[32].mxu1 %v687_v0 }
 0x1cc   : > { %v688_v6 = vadd.f32 %v656_v5, %v624_v3  ;;  %v529_v7 = vpop.f32.mrb[38].mxu0 }
 0x1cd   : > { %v625_v8 = vmul.f32 %v529_v7, %v529_v7  ;;  %v531_v10 = vpop.f32.mrb[39].mxu0 }
 0x1ce   : > { %v657_v11 = vmul.f32 %v531_v10, %v531_v10  ;;  %1210 = vmatprep.mubr.f32.mxu1 %v688_v6 }
 0x1d0   : > { %v689_v13 = vadd.f32 %v657_v11, %v625_v8  ;;  %v535_v14 = vpop.f32.mrb[40].mxu0 }
 0x1d1   : > { %v626_v15 = vmul.f32 %v535_v14, %v535_v14  ;;  %v537_v16 = vpop.f32.mrb[41].mxu0 }
 0x1d2   : > { %v658_v17 = vmul.f32 %v537_v16, %v537_v16  ;;  %1211 = vmatmul.mubr.f32.gmra.mrb[34].mxu1 %v689_v13 }
 0x1d4   : > { %v690_v18 = vadd.f32 %v658_v17, %v626_v15  ;;  %v541_v19 = vpop.f32.mrb[42].mxu0 }
 0x1d5   : > { %v627_v20 = vmul.f32 %v541_v19, %v541_v19  ;;  %v543_v21 = vpop.f32.mrb[43].mxu0 }
 0x1d6   : > { %v659_v23 = vmul.f32 %v543_v21, %v543_v21  ;;  %1213 = vmatprep.mubr.f32.mxu1 %v690_v18 }
 0x1d8   : > { %v691_v24 = vadd.f32 %v659_v23, %v627_v20  ;;  %v547_v25 = vpop.f32.mrb[44].mxu0 }
 0x1d9   : > { %v628_v26 = vmul.f32 %v547_v25, %v547_v25  ;;  %v549_v27 = vpop.f32.mrb[45].mxu0 }
 0x1da   : > { %v660_v28 = vmul.f32 %v549_v27, %v549_v27  ;;  %1214 = vmatmul.mubr.f32.gmra.mrb[36].mxu1 %v691_v24 }
 0x1dc   : > { %v692_v29 = vadd.f32 %v660_v28, %v628_v26  ;;  %v553_v30 = vpop.f32.mrb[46].mxu0 }
 0x1dd   : > { %v629_v31 = vmul.f32 %v553_v30, %v553_v30  ;;  %v555_v33 = vpop.f32.mrb[47].mxu0 }
 0x1de   : > { %v661_v34 = vmul.f32 %v555_v33, %v555_v33  ;;  %1216 = vmatprep.mubr.f32.mxu1 %v692_v29 }
 0x1e0   : > { %v693_v35 = vadd.f32 %v661_v34, %v629_v31 }
 0x1e2   : > { %1217 = vmatmul.mubr.f32.gmra.mrb[38].mxu1 %v693_v35 }
 0x1e3   : > { %1219 = vmatprep.mubr.f32.mxu1 %v1876_v2 }
 0x1e6   : > { %1220 = vmatmul.mubr.f32.gmra.mrb[40].mxu1 %v1878_v12 }
 0x1e7   : > { %1222 = vmatprep.mubr.f32.mxu1 %v1880_v22 }
 0x1ea   : > { %1223 = vmatmul.mubr.f32.gmra.mrb[42].mxu1 %v1882_v32 }
 0x1eb   : > { %1225 = vmatprep.mubr.f32.mxu1 %v1884_v42 }
 0x1ee   : > { %1226 = vmatmul.mubr.f32.gmra.mrb[44].mxu1 %v1886_v52 }
 0x1ef   : > { %1228 = vmatprep.mubr.f32.mxu1 %v1888_v62 }
 0x1f2   : > { %1229 = vmatmul.mubr.f32.gmra.mrb[46].mxu1 %v1890_v9 }
 0x25d   : > { %v1185_v36 = vpop.f32.mrb[16].mxu1 }
 0x25e   : > { %944 = vst [vmem:[%s1901_s20 + $0x8] sm:$0xff] %v1185_v36  ;;  %v784_v2 = vpop.f32.mrb[17].mxu1 }
 0x25f   : > { %943 = vst [vmem:[%s1901_s20] sm:$0xff] %v784_v2 }
 0x265   : > { %v1188_v12 = vpop.f32.mrb[18].mxu1 }
 0x266   : > { %946 = vst [vmem:[%s1901_s20 + $0x18] sm:$0xff] %v1188_v12  ;;  %v794_v22 = vpop.f32.mrb[19].mxu1 }
 0x267   : > { %945 = vst [vmem:[%s1901_s20 + $0x10] sm:$0xff] %v794_v22 }
 0x26d   : > { %v1191_v32 = vpop.f32.mrb[20].mxu1 }
 0x26e   : > { %948 = vst [vmem:[%s1901_s20 + $0x28] sm:$0xff] %v1191_v32  ;;  %v804_v42 = vpop.f32.mrb[21].mxu1 }
 0x26f   : > { %947 = vst [vmem:[%s1901_s20 + $0x20] sm:$0xff] %v804_v42 }
 0x275   : > { %v1194_v52 = vpop.f32.mrb[22].mxu1 }
 0x276   : > { %950 = vst [vmem:[%s1901_s20 + $0x38] sm:$0xff] %v1194_v52  ;;  %v814_v62 = vpop.f32.mrb[23].mxu1 }
 0x277   : > { %949 = vst [vmem:[%s1901_s20 + $0x30] sm:$0xff] %v814_v62 }
 0x27d   : > { %v1197_v9 = vpop.f32.mrb[24].mxu1 }
 0x27e   : > { %952 = vst [vmem:[%s1901_s20 + $0x48] sm:$0xff] %v1197_v9  ;;  %v824_v37 = vpop.f32.mrb[25].mxu1 }
 0x27f   : > { %951 = vst [vmem:[%s1901_s20 + $0x40] sm:$0xff] %v824_v37 }
 0x285   : > { %v1200_v38 = vpop.f32.mrb[26].mxu1 }
 0x286   : > { %954 = vst [vmem:[%s1901_s20 + $0x58] sm:$0xff] %v1200_v38  ;;  %v834_v39 = vpop.f32.mrb[27].mxu1 }
 0x287   : > { %953 = vst [vmem:[%s1901_s20 + $0x50] sm:$0xff] %v834_v39 }
 0x28d   : > { %v1203_v40 = vpop.f32.mrb[28].mxu1 }
 0x28e   : > { %956 = vst [vmem:[%s1901_s20 + $0x68] sm:$0xff] %v1203_v40  ;;  %v844_v41 = vpop.f32.mrb[29].mxu1 }
 0x28f   : > { %955 = vst [vmem:[%s1901_s20 + $0x60] sm:$0xff] %v844_v41 }
 0x295   : > { %v1206_v43 = vpop.f32.mrb[30].mxu1 }
 0x296   : > { %958 = vst [vmem:[%s1901_s20 + $0x78] sm:$0xff] %v1206_v43  ;;  %v854_v44 = vpop.f32.mrb[31].mxu1 }
 0x297   : > { %957 = vst [vmem:[%s1901_s20 + $0x70] sm:$0xff] %v854_v44 }
 0x29d   : > { %v1209_v45 = vpop.f32.mrb[32].mxu1 }
 0x29e   : > { %960 = vst [vmem:[%s1901_s20 + $0x88] sm:$0xff] %v1209_v45  ;;  %v864_v46 = vpop.f32.mrb[33].mxu1 }
 0x29f   : > { %959 = vst [vmem:[%s1901_s20 + $0x80] sm:$0xff] %v864_v46 }
 0x2a5   : > { %v1212_v47 = vpop.f32.mrb[34].mxu1 }
 0x2a6   : > { %962 = vst [vmem:[%s1901_s20 + $0x98] sm:$0xff] %v1212_v47  ;;  %v874_v48 = vpop.f32.mrb[35].mxu1 }
 0x2a7   : > { %961 = vst [vmem:[%s1901_s20 + $0x90] sm:$0xff] %v874_v48 }
 0x2ad   : > { %v1215_v49 = vpop.f32.mrb[36].mxu1 }
 0x2ae   : > { %964 = vst [vmem:[%s1901_s20 + $0xa8] sm:$0xff] %v1215_v49  ;;  %v884_v50 = vpop.f32.mrb[37].mxu1 }
 0x2af   : > { %963 = vst [vmem:[%s1901_s20 + $0xa0] sm:$0xff] %v884_v50 }
 0x2b5   : > { %v1218_v51 = vpop.f32.mrb[38].mxu1 }
 0x2b6   : > { %966 = vst [vmem:[%s1901_s20 + $0xb8] sm:$0xff] %v1218_v51  ;;  %v894_v53 = vpop.f32.mrb[39].mxu1 }
 0x2b7   : > { %965 = vst [vmem:[%s1901_s20 + $0xb0] sm:$0xff] %v894_v53 }
 0x2b9   : > { %v1221_v54 = vpop.f32.mrb[40].mxu1 }
 0x2ba   : > { %968 = vst [vmem:[%s1901_s20 + $0xc8] sm:$0xff] %v1221_v54  ;;  %v904_v55 = vpop.f32.mrb[41].mxu1 }
 0x2bb   : > { %967 = vst [vmem:[%s1901_s20 + $0xc0] sm:$0xff] %v904_v55 }
 0x2bd   : > { %v1224_v56 = vpop.f32.mrb[42].mxu1 }
 0x2be   : > { %970 = vst [vmem:[%s1901_s20 + $0xd8] sm:$0xff] %v1224_v56  ;;  %v914_v57 = vpop.f32.mrb[43].mxu1 }
 0x2bf   : > { %969 = vst [vmem:[%s1901_s20 + $0xd0] sm:$0xff] %v914_v57 }
 0x2c1   : > { %v1227_v58 = vpop.f32.mrb[44].mxu1 }
 0x2c2   : > { %972 = vst [vmem:[%s1901_s20 + $0xe8] sm:$0xff] %v1227_v58  ;;  %v924_v59 = vpop.f32.mrb[45].mxu1 }
 0x2c3   : > { %971 = vst [vmem:[%s1901_s20 + $0xe0] sm:$0xff] %v924_v59 }
 0x2c5   : > { %v1230_v60 = vpop.f32.mrb[46].mxu1 }
 0x2c6   : > { %974 = vst [vmem:[%s1901_s20 + $0xf8] sm:$0xff] %v1230_v60  ;;  %v934_v61 = vpop.f32.mrb[47].mxu1 }
 0x2c7   : > { %973 = vst [vmem:[%s1901_s20 + $0xf0] sm:$0xff] %v934_v61 }
 0x2c8   : > { %1531 = shalt.err (!%p1528_p1)
}
 0x2c9   : > { %s1532_s24 = scalar_lea.hbm %s1938_s29, 4096  ;;  %s1536_s5 = scalar_lea.hbm %s1989_s3, 8192 }
 0x2ca   : > { %p1533_p13 = scmp.ne.s32.totalorder %s1938_s29, %s1532_s24  ;;  %p1537_p4 = scmp.lt.u32.totalorder %s1938_s29, %s1989_s3 }
 0x2cb   : > { %p1538_p7 = scmp.lt.u32.totalorder %s1536_s5, %s1532_s24  ;;  %p1540_p11 = scmp.lt.u32.totalorder %s1532_s24, %s1938_s29 }
 0x2cc   : > { %p1534_p6 = pnand %p1533_p13, %p2003_p0 }
 0x2cd   : > { %p1539_p8 = por %p1538_p7, %p1537_p4 }
 0x2ce   : > { %p1535_p10 = pneg %p1534_p6 }
 0x2cf   : > { %p1541_p2 = por %p1540_p11, %p1539_p8 }
 0x2d1   : > { %p1542_p3 = pnand %p1541_p2, %p1535_p10 }
 0x2d3   : > { %1545 = shalt.err (!%p1542_p3)
}
 0x2d4   : > { %s1598_s18 = smov 128   ;;  %s1599_s20 = smov 8  }
 0x2d5   : > { %1369 = dma.vmem_to_hbm [thread:$0]  (%p2003_p0), %s1940_s8, 4096, %s1938_s29, %s976_s30, %s1598_s18, %s1598_s18, %s1599_s20  }
 0x2d6 PF: > { %s1004_s7 = sand.u32 1, %s1576_s12   ;;  %p2004_p5 = scmp.ne.s32.totalorder %s1994_s19, 0 }
 0x2d7   : > { %p2005_p9 = scmp.ge.s32.totalorder %s1588_s15, 2  ;;  %s1005_s27 = scalar_lea.sflag [#allocation4], %s1004_s7 }
 0x2d9   : > { %p1383_p12 = pnand %p2005_p9, %p2004_p5 }
 0x2db   : > { %1571 = dma.done.wait (!%p1383_p12), %s1005_s27, 4096  }
 0x2dc   : > { %1573 = vsyncadd (!%p1383_p12), %s1005_s27, 4294963200  ;;  %p17_p1 = scmp.ge.s32.totalorder %s1733_s6, 4   ;;  %s2006_s12 = smov %s1580_s13 }
 0x2dd   : > { %s2007_s13 = smov %s1584_s14  ;;  %s2008_s14 = smov %s1742_s11 }
 0x2de   : > { %s2009_s15 = smov %s1733_s6  ;;  %19 = sbr.rel (!%p17_p1) target bundleno = 6 (0x6), region = 85 }
 0x2e5   :  { %1010 = vsyncpa [#allocation3], 1 }
 0x2e6   :  { %1012 = vsyncpa [#allocation3 + $0x1], 1 }
 0x2e7   :  { %1013 = vsyncpa [#allocation6], 1 }
 0x2e8   :  { %1014 = vsyncpa [#allocation4], 1 }
 0x2e9   :  { %1016 = vsyncpa [#allocation4 + $0x1], 1 }

</bundles_post_ra>
